<compile_context>
chip_gen: v7x
topology: tpu7x:2x2x1
jax: 0.10.0
libtpu: 0.0.40
codegen_flags: <defaults>
</compile_context>

<pallas_src>
import functools

import jax
import jax.numpy as jnp
from jax.experimental import pallas as pl
from jax.experimental.pallas import tpu as pltpu


def _round_up(x, m):
    return (x + m - 1) // m * m


def merge_layer_kernel(x1_ref, x2_ref, w1_ref, b1_ref, w2_ref, b2_ref,
                       o_ref, xcat_ref):
    bf16 = jnp.bfloat16
    tb, d1 = x1_ref.shape
    d2 = x2_ref.shape[1]
    d1p = _round_up(d1, 128)
    d2p = xcat_ref.shape[1] - d1p

    # Realize the concat in a bf16 VMEM scratch with lane-aligned slabs.  Each
    # slab is zero-padded in-register up to its 128-lane boundary so both stores
    # are full-width (unmasked, no cross-lane rotate) and the padding lanes are
    # freshly written each step (they face zero rows of w1, so they must stay
    # finite -> write exact zeros).
    x1v = x1_ref[...].astype(bf16)
    if d1p > d1:
        x1v = jnp.concatenate([x1v, jnp.zeros((tb, d1p - d1), bf16)], axis=1)
    x2v = x2_ref[...].astype(bf16)
    if d2p > d2:
        x2v = jnp.concatenate([x2v, jnp.zeros((tb, d2p - d2), bf16)], axis=1)
    xcat_ref[:, :d1p] = x1v
    xcat_ref[:, d1p:] = x2v

    # fc1: a single MXU matmul over K = d1p + d2p; bf16 operands, f32 accumulate.
    h = jnp.dot(xcat_ref[...], w1_ref[...], preferred_element_type=jnp.float32)
    # Bias + ReLU epilogue in f32 on the VPU (padded hidden lanes stay exactly 0).
    h = jnp.maximum(h + b1_ref[...], 0.0)
    # fc2: bf16 operands, f32 accumulate, exact-width output store.
    out = jnp.dot(h.astype(bf16), w2_ref[...], preferred_element_type=jnp.float32)
    o_ref[...] = (out + b2_ref[...]).astype(o_ref.dtype)


def prepare_params(w1, b1, w2, b2, dim1, compute_dtype=jnp.bfloat16):
    """One-time parameter prep (do NOT call per forward pass).

    Weights must be pre-transposed to (in, out) layout (PyTorch nn.Linear stores
    (out, in) -- pass `weight.T`):
        w1: (dim1 + dim2, dim3),  b1: (dim3,)
        w2: (dim3, dim4),         b2: (dim4,)

    Pads dim1 / dim2 (as zero ROWS of w1, splitting at `dim1`) and dim3 up to
    multiples of 128 so the in-kernel concat slabs and hidden activations are
    lane-dense, and casts the MXU operands to bf16.  Biases stay f32 (epilogue).
    All padding is exact (zeros are exactly representable in bf16).
    """
    k, d3 = w1.shape
    d3_, d4 = w2.shape
    d2 = k - dim1
    assert dim1 > 0 and d2 > 0, "dim1 must split the input rows of w1"
    assert d3_ == d3 and b1.shape == (d3,) and b2.shape == (d4,)
    d1p, d2p, d3p = _round_up(dim1, 128), _round_up(d2, 128), _round_up(d3, 128)

    w1p = jnp.zeros((d1p + d2p, d3p), compute_dtype)
    w1p = w1p.at[:dim1, :d3].set(w1[:dim1].astype(compute_dtype))
    w1p = w1p.at[d1p:d1p + d2, :d3].set(w1[dim1:].astype(compute_dtype))
    b1p = jnp.zeros((1, d3p), jnp.float32).at[:, :d3].set(b1.astype(jnp.float32))
    w2p = jnp.zeros((d3p, d4), compute_dtype).at[:d3, :].set(w2.astype(compute_dtype))
    b2p = b2.reshape(1, d4).astype(jnp.float32)
    return w1p, b1p, w2p, b2p


def merge_layer_forward(x1, x2, params, *, block_b=512, min_grid_steps=2,
                        single_buffer_weights=True):
    """x1: (B, dim1), x2: (B, dim2) -> (B, dim4) float32."""
    w1p, b1p, w2p, b2p = params
    B, d1 = x1.shape
    B2, d2 = x2.shape
    assert B == B2, "batch dims must match"
    d1p, d2p = _round_up(d1, 128), _round_up(d2, 128)
    kp = d1p + d2p
    d3p = w1p.shape[1]
    d4 = w2p.shape[1]
    assert w1p.shape == (kp, d3p) and w2p.shape[0] == d3p
    assert b1p.shape == (1, d3p) and b2p.shape == (1, d4)

    # Batch tile: multiple of 8 sublanes; keep at least `min_grid_steps` grid
    # steps when B allows (so both v7x TensorCores get work and the BlockSpec
    # pipeline can overlap the x1/x2/out DMAs with compute), capped by block_b
    # (sweep block_b up to 1024 on v6e's 128 MiB VMEM for large B).
    tb = min(block_b, _round_up(B, 8))
    if min_grid_steps > 1:
        tb = min(tb, max(8, _round_up(pl.cdiv(B, min_grid_steps), 8)))
    grid = (pl.cdiv(B, tb),)

    flops = 2 * B * (kp * d3p + d3p * d4)
    bytes_accessed = (x1.size * x1.dtype.itemsize + x2.size * x2.dtype.itemsize
                      + w1p.size * w1p.dtype.itemsize
                      + w2p.size * w2p.dtype.itemsize
                      + b1p.size * 4 + b2p.size * 4 + B * d4 * 4)

    def build(single_buffered):
        if single_buffered:
            # Constant index_map -> no point double-buffering these blocks.
            resident = functools.partial(pl.BlockSpec, pipeline_mode=pl.Buffered(1))
        else:
            resident = pl.BlockSpec

        # Explicit VMEM budget: double-buffered streamed x1/x2/out tiles,
        # resident weights/biases (x2 if the pipeline double-buffers them) and
        # the bf16 concat scratch; 2x headroom, clamped to a chip-safe range.
        wbuf = 1 if single_buffered else 2
        need = (2 * tb * d1 * x1.dtype.itemsize
                + 2 * tb * d2 * x2.dtype.itemsize
                + 2 * tb * d4 * 4
                + wbuf * (w1p.size * w1p.dtype.itemsize
                          + w2p.size * w2p.dtype.itemsize
                          + b1p.size * 4 + b2p.size * 4)
                + tb * kp * 2)
        vmem_limit = int(min(max(2 * need, 32 * 2**20), 100 * 2**20))

        return pl.pallas_call(
            merge_layer_kernel,
            out_shape=jax.ShapeDtypeStruct((B, d4), jnp.float32),
            grid_spec=pltpu.PrefetchScalarGridSpec(
                num_scalar_prefetch=0,
                grid=grid,
                in_specs=[
                    pl.BlockSpec((tb, d1), lambda i: (i, 0)),   # x1 (streamed)
                    pl.BlockSpec((tb, d2), lambda i: (i, 0)),   # x2 (streamed)
                    resident((kp, d3p), lambda i: (0, 0)),      # w1 (resident)
                    resident((1, d3p), lambda i: (0, 0)),       # b1 (resident)
                    resident((d3p, d4), lambda i: (0, 0)),      # w2 (resident)
                    resident((1, d4), lambda i: (0, 0)),        # b2 (resident)
                ],
                out_specs=pl.BlockSpec((tb, d4), lambda i: (i, 0)),
                scratch_shapes=[pltpu.VMEM((tb, kp), jnp.bfloat16)],
            ),
            compiler_params=pltpu.CompilerParams(
                dimension_semantics=("parallel",),
                vmem_limit_bytes=vmem_limit),
            cost_estimate=pl.CostEstimate(flops=flops, transcendentals=0,
                                          bytes_accessed=bytes_accessed),
        )

    if single_buffer_weights:
        try:
            return build(True)(x1, x2, w1p, b1p, w2p, b2p)
        except Exception:
            # pl.Buffered(1) not accepted by this jax/pallas build: fall back to
            # default buffering (only VMEM usage changes, not correctness).
            pass
    return build(False)(x1, x2, w1p, b1p, w2p, b2p)


def init_params(key, dim1, dim2, dim3, dim4, dtype=jnp.float32):
    """Deterministic init mimicking nn.Linear's U(-1/sqrt(fan_in), 1/sqrt(fan_in)).

    Weights are stored pre-transposed, i.e. (in, out), vs PyTorch's (out, in).
    """
    k1, k2, k3, k4 = jax.random.split(key, 4)
    fan1 = dim1 + dim2
    bound1 = 1.0 / jnp.sqrt(fan1)
    bound2 = 1.0 / jnp.sqrt(dim3)
    w1 = jax.random.uniform(k1, (fan1, dim3), dtype, -bound1, bound1)
    b1 = jax.random.uniform(k2, (dim3,), dtype, -bound1, bound1)
    w2 = jax.random.uniform(k3, (dim3, dim4), dtype, -bound2, bound2)
    b2 = jax.random.uniform(k4, (dim4,), dtype, -bound2, bound2)
    return w1, b1, w2, b2


def reference_forward_f32(x1, x2, w1, b1, w2, b2):
    x = jnp.concatenate([x1, x2], axis=1)
    h = jnp.maximum(x @ w1 + b1, 0.0)
    return h @ w2 + b2


def reference_forward_bf16(x1, x2, w1, b1, w2, b2):
    """Matches the kernel's numerics: bf16 MXU operands, f32 accumulate/epilogue."""
    bf = jnp.bfloat16
    x = jnp.concatenate([x1, x2], axis=1).astype(bf)
    h = jnp.dot(x, w1.astype(bf), preferred_element_type=jnp.float32) + b1
    h = jnp.maximum(h, 0.0)
    return jnp.dot(h.astype(bf), w2.astype(bf),
                   preferred_element_type=jnp.float32) + b2


if __name__ == "__main__":
    # Small shapes consistent with the module: batch=8, dim1=32, dim2=32,
    # hidden dim3=64, output dim4=16.
    B, dim1, dim2, dim3, dim4 = 8, 32, 32, 64, 16

    key = jax.random.PRNGKey(0)
    kx1, kx2, kparam = jax.random.split(key, 3)
    x1 = jax.random.normal(kx1, (B, dim1), jnp.float32)
    x2 = jax.random.normal(kx2, (B, dim2), jnp.float32)
    w1, b1, w2, b2 = init_params(kparam, dim1, dim2, dim3, dim4)

    params = prepare_params(w1, b1, w2, b2, dim1)   # one-time: lane pad + bf16
    out = merge_layer_forward(x1, x2, params)
    out = jax.block_until_ready(out)

    assert out.shape == (B, dim4)
    ref_matched = reference_forward_bf16(x1, x2, w1, b1, w2, b2)
    ref_f32 = reference_forward_f32(x1, x2, w1, b1, w2, b2)
    assert jnp.allclose(out, ref_matched, atol=1e-4, rtol=1e-4), \
        float(jnp.max(jnp.abs(out - ref_matched)))
    assert jnp.allclose(out, ref_f32, atol=3e-2, rtol=3e-2), \
        float(jnp.max(jnp.abs(out - ref_f32)))
    print("KERNEL_OK")
</pallas_src>

<mosaic_0001>
module attributes {stable_mosaic.version = 11 : i64} {
  func.func @merge_layer_kernel(%arg0: i32, %arg1: memref<8x32xf32, #tpu.memory_space<vmem>>, %arg2: memref<8x32xf32, #tpu.memory_space<vmem>>, %arg3: memref<256x128xbf16, #tpu.memory_space<vmem>>, %arg4: memref<1x128xf32, #tpu.memory_space<vmem>>, %arg5: memref<128x16xbf16, #tpu.memory_space<vmem>>, %arg6: memref<1x16xf32, #tpu.memory_space<vmem>>, %arg7: memref<8x16xf32, #tpu.memory_space<vmem>>, %arg8: memref<8x256xbf16, #tpu.memory_space<vmem>>) attributes {dimension_semantics = [#tpu.dimension_semantics<parallel>], iteration_bounds = array<i64: 1>, scalar_prefetch = 0 : i64, scratch_operands = 1 : i64, tpu.core_type = #tpu.core_type<tc>, window_params = [{transform_indices = @transform_0, window_bounds = array<i64: 8, 32>}, {transform_indices = @transform_1, window_bounds = array<i64: 8, 32>}, {pipeline_mode = #tpu.pipeline_mode<synchronous>, transform_indices = @transform_2, window_bounds = array<i64: 256, 128>}, {pipeline_mode = #tpu.pipeline_mode<synchronous>, transform_indices = @transform_3, window_bounds = array<i64: 1, 128>}, {pipeline_mode = #tpu.pipeline_mode<synchronous>, transform_indices = @transform_4, window_bounds = array<i64: 128, 16>}, {pipeline_mode = #tpu.pipeline_mode<synchronous>, transform_indices = @transform_5, window_bounds = array<i64: 1, 16>}, {transform_indices = @transform_6, window_bounds = array<i64: 8, 16>}]} {
    %c0 = arith.constant 0 : index
    %c0_0 = arith.constant 0 : index
    %0 = vector.load %arg1[%c0, %c0_0] : memref<8x32xf32, #tpu.memory_space<vmem>>, vector<8x32xf32>
    %1 = arith.truncf %0 : vector<8x32xf32> to vector<8x32xbf16>
    %cst = arith.constant 0.000000e+00 : bf16
    %2 = vector.broadcast %cst : bf16 to vector<8x96xbf16>
    %3 = tpu.concatenate %1, %2 in 1 : vector<8x32xbf16>, vector<8x96xbf16> -> vector<8x128xbf16>
    %c0_1 = arith.constant 0 : index
    %c0_2 = arith.constant 0 : index
    %4 = vector.load %arg2[%c0_1, %c0_2] : memref<8x32xf32, #tpu.memory_space<vmem>>, vector<8x32xf32>
    %5 = arith.truncf %4 : vector<8x32xf32> to vector<8x32xbf16>
    %cst_3 = arith.constant 0.000000e+00 : bf16
    %6 = vector.broadcast %cst_3 : bf16 to vector<8x96xbf16>
    %7 = tpu.concatenate %5, %6 in 1 : vector<8x32xbf16>, vector<8x96xbf16> -> vector<8x128xbf16>
    %c0_4 = arith.constant 0 : index
    %c0_5 = arith.constant 0 : index
    %8 = vector.load %arg8[%c0_4, %c0_5] : memref<8x256xbf16, #tpu.memory_space<vmem>>, vector<8x128xbf16>
    tpu.vector_store %arg8[%c0_4, %c0_5], %3 {strides = array<i32>} : memref<8x256xbf16, #tpu.memory_space<vmem>>, vector<8x128xbf16>,
    %c0_6 = arith.constant 0 : index
    %c128 = arith.constant 128 : index
    %9 = vector.load %arg8[%c0_6, %c128] : memref<8x256xbf16, #tpu.memory_space<vmem>>, vector<8x128xbf16>
    tpu.vector_store %arg8[%c0_6, %c128], %7 {strides = array<i32>} : memref<8x256xbf16, #tpu.memory_space<vmem>>, vector<8x128xbf16>,
    %c0_7 = arith.constant 0 : index
    %c0_8 = arith.constant 0 : index
    %10 = vector.load %arg8[%c0_7, %c0_8] : memref<8x256xbf16, #tpu.memory_space<vmem>>, vector<8x256xbf16>
    %c0_9 = arith.constant 0 : index
    %c0_10 = arith.constant 0 : index
    %11 = vector.load %arg3[%c0_9, %c0_10] : memref<256x128xbf16, #tpu.memory_space<vmem>>, vector<256x128xbf16>
    %cst_11 = arith.constant dense<0.000000e+00> : vector<8x128xf32>
    %12 = tpu.matmul %10, %11, %cst_11 {dimension_numbers = #tpu.dot_dimension_numbers<[1], [0], [0], [1], [0, 0, 1, 1], [], []>} : vector<8x256xbf16>, vector<256x128xbf16>, vector<8x128xf32> -> vector<8x128xf32>
    %c0_12 = arith.constant 0 : index
    %c0_13 = arith.constant 0 : index
    %13 = vector.load %arg4[%c0_12, %c0_13] : memref<1x128xf32, #tpu.memory_space<vmem>>, vector<1x128xf32>
    %14 = vector.broadcast %13 : vector<1x128xf32> to vector<8x128xf32>
    %15 = arith.addf %12, %14 : vector<8x128xf32>
    %cst_14 = arith.constant 0.000000e+00 : f32
    %16 = vector.broadcast %cst_14 : f32 to vector<8x128xf32>
    %17 = arith.maximumf %15, %16 : vector<8x128xf32>
    %18 = arith.truncf %17 : vector<8x128xf32> to vector<8x128xbf16>
    %c0_15 = arith.constant 0 : index
    %c0_16 = arith.constant 0 : index
    %19 = vector.load %arg5[%c0_15, %c0_16] : memref<128x16xbf16, #tpu.memory_space<vmem>>, vector<128x16xbf16>
    %cst_17 = arith.constant dense<0.000000e+00> : vector<8x16xf32>
    %20 = tpu.matmul %18, %19, %cst_17 {dimension_numbers = #tpu.dot_dimension_numbers<[1], [0], [0], [1], [0, 0, 1, 1], [], []>} : vector<8x128xbf16>, vector<128x16xbf16>, vector<8x16xf32> -> vector<8x16xf32>
    %c0_18 = arith.constant 0 : index
    %c0_19 = arith.constant 0 : index
    %21 = vector.load %arg6[%c0_18, %c0_19] : memref<1x16xf32, #tpu.memory_space<vmem>>, vector<1x16xf32>
    %22 = vector.broadcast %21 : vector<1x16xf32> to vector<8x16xf32>
    %23 = arith.addf %20, %22 : vector<8x16xf32>
    %c0_20 = arith.constant 0 : index
    %c0_21 = arith.constant 0 : index
    %24 = vector.load %arg7[%c0_20, %c0_21] : memref<8x16xf32, #tpu.memory_space<vmem>>, vector<8x16xf32>
    tpu.vector_store %arg7[%c0_20, %c0_21], %23 {strides = array<i32>} : memref<8x16xf32, #tpu.memory_space<vmem>>, vector<8x16xf32>,
    return
  }
  func.func @transform_0(%arg0: i32) -> (i32, i32) {
    %c0_i32 = arith.constant 0 : i32
    %c0_i32_0 = arith.constant 0 : i32
    return %arg0, %c0_i32 : i32, i32
  }
  func.func @transform_1(%arg0: i32) -> (i32, i32) {
    %c0_i32 = arith.constant 0 : i32
    %c0_i32_0 = arith.constant 0 : i32
    return %arg0, %c0_i32 : i32, i32
  }
  func.func @transform_2(%arg0: i32) -> (i32, i32) {
    %c0_i32 = arith.constant 0 : i32
    %c0_i32_0 = arith.constant 0 : i32
    %c0_i32_1 = arith.constant 0 : i32
    return %c0_i32, %c0_i32_0 : i32, i32
  }
  func.func @transform_3(%arg0: i32) -> (i32, i32) {
    %c0_i32 = arith.constant 0 : i32
    %c0_i32_0 = arith.constant 0 : i32
    %c0_i32_1 = arith.constant 0 : i32
    return %c0_i32, %c0_i32_0 : i32, i32
  }
  func.func @transform_4(%arg0: i32) -> (i32, i32) {
    %c0_i32 = arith.constant 0 : i32
    %c0_i32_0 = arith.constant 0 : i32
    %c0_i32_1 = arith.constant 0 : i32
    return %c0_i32, %c0_i32_0 : i32, i32
  }
  func.func @transform_5(%arg0: i32) -> (i32, i32) {
    %c0_i32 = arith.constant 0 : i32
    %c0_i32_0 = arith.constant 0 : i32
    %c0_i32_1 = arith.constant 0 : i32
    return %c0_i32, %c0_i32_0 : i32, i32
  }
  func.func @transform_6(%arg0: i32) -> (i32, i32) {
    %c0_i32 = arith.constant 0 : i32
    %c0_i32_0 = arith.constant 0 : i32
    return %arg0, %c0_i32 : i32, i32
  }
}

module attributes {stable_mosaic.version = 11 : i64} {
  func.func @merge_layer_kernel(%arg0: i32, %arg1: memref<8x32xf32, #tpu.memory_space<vmem>>, %arg2: memref<8x32xf32, #tpu.memory_space<vmem>>, %arg3: memref<256x128xbf16, #tpu.memory_space<vmem>>, %arg4: memref<1x128xf32, #tpu.memory_space<vmem>>, %arg5: memref<128x16xbf16, #tpu.memory_space<vmem>>, %arg6: memref<1x16xf32, #tpu.memory_space<vmem>>, %arg7: memref<8x16xf32, #tpu.memory_space<vmem>>, %arg8: memref<8x256xbf16, #tpu.memory_space<vmem>>) attributes {dimension_semantics = [#tpu.dimension_semantics<parallel>], iteration_bounds = array<i64: 1>, scalar_prefetch = 0 : i64, scratch_operands = 1 : i64, tpu.core_type = #tpu.core_type<tc>, window_params = [{transform_indices = @transform_0, window_bounds = array<i64: 8, 32>}, {transform_indices = @transform_1, window_bounds = array<i64: 8, 32>}, {pipeline_mode = #tpu.pipeline_mode<synchronous>, transform_indices = @transform_2, window_bounds = array<i64: 256, 128>}, {pipeline_mode = #tpu.pipeline_mode<synchronous>, transform_indices = @transform_3, window_bounds = array<i64: 1, 128>}, {pipeline_mode = #tpu.pipeline_mode<synchronous>, transform_indices = @transform_4, window_bounds = array<i64: 128, 16>}, {pipeline_mode = #tpu.pipeline_mode<synchronous>, transform_indices = @transform_5, window_bounds = array<i64: 1, 16>}, {transform_indices = @transform_6, window_bounds = array<i64: 8, 16>}]} {
    %c0 = arith.constant 0 : index
    %c0_0 = arith.constant 0 : index
    %0 = vector.load %arg1[%c0, %c0_0] : memref<8x32xf32, #tpu.memory_space<vmem>>, vector<8x32xf32>
    %1 = arith.truncf %0 : vector<8x32xf32> to vector<8x32xbf16>
    %cst = arith.constant 0.000000e+00 : bf16
    %2 = vector.broadcast %cst : bf16 to vector<8x96xbf16>
    %3 = tpu.concatenate %1, %2 in 1 : vector<8x32xbf16>, vector<8x96xbf16> -> vector<8x128xbf16>
    %c0_1 = arith.constant 0 : index
    %c0_2 = arith.constant 0 : index
    %4 = vector.load %arg2[%c0_1, %c0_2] : memref<8x32xf32, #tpu.memory_space<vmem>>, vector<8x32xf32>
    %5 = arith.truncf %4 : vector<8x32xf32> to vector<8x32xbf16>
    %cst_3 = arith.constant 0.000000e+00 : bf16
    %6 = vector.broadcast %cst_3 : bf16 to vector<8x96xbf16>
    %7 = tpu.concatenate %5, %6 in 1 : vector<8x32xbf16>, vector<8x96xbf16> -> vector<8x128xbf16>
    %c0_4 = arith.constant 0 : index
    %c0_5 = arith.constant 0 : index
    %8 = vector.load %arg8[%c0_4, %c0_5] : memref<8x256xbf16, #tpu.memory_space<vmem>>, vector<8x128xbf16>
    tpu.vector_store %arg8[%c0_4, %c0_5], %3 {strides = array<i32>} : memref<8x256xbf16, #tpu.memory_space<vmem>>, vector<8x128xbf16>,
    %c0_6 = arith.constant 0 : index
    %c128 = arith.constant 128 : index
    %9 = vector.load %arg8[%c0_6, %c128] : memref<8x256xbf16, #tpu.memory_space<vmem>>, vector<8x128xbf16>
    tpu.vector_store %arg8[%c0_6, %c128], %7 {strides = array<i32>} : memref<8x256xbf16, #tpu.memory_space<vmem>>, vector<8x128xbf16>,
    %c0_7 = arith.constant 0 : index
    %c0_8 = arith.constant 0 : index
    %10 = vector.load %arg8[%c0_7, %c0_8] : memref<8x256xbf16, #tpu.memory_space<vmem>>, vector<8x256xbf16>
    %c0_9 = arith.constant 0 : index
    %c0_10 = arith.constant 0 : index
    %11 = vector.load %arg3[%c0_9, %c0_10] : memref<256x128xbf16, #tpu.memory_space<vmem>>, vector<256x128xbf16>
    %cst_11 = arith.constant dense<0.000000e+00> : vector<8x128xf32>
    %12 = tpu.matmul %10, %11, %cst_11 {dimension_numbers = #tpu.dot_dimension_numbers<[1], [0], [0], [1], [0, 0, 1, 1], [], []>} : vector<8x256xbf16>, vector<256x128xbf16>, vector<8x128xf32> -> vector<8x128xf32>
    %c0_12 = arith.constant 0 : index
    %c0_13 = arith.constant 0 : index
    %13 = vector.load %arg4[%c0_12, %c0_13] : memref<1x128xf32, #tpu.memory_space<vmem>>, vector<1x128xf32>
    %14 = vector.broadcast %13 : vector<1x128xf32> to vector<8x128xf32>
    %15 = arith.addf %12, %14 : vector<8x128xf32>
    %cst_14 = arith.constant 0.000000e+00 : f32
    %16 = vector.broadcast %cst_14 : f32 to vector<8x128xf32>
    %17 = arith.maximumf %15, %16 : vector<8x128xf32>
    %18 = arith.truncf %17 : vector<8x128xf32> to vector<8x128xbf16>
    %c0_15 = arith.constant 0 : index
    %c0_16 = arith.constant 0 : index
    %19 = vector.load %arg5[%c0_15, %c0_16] : memref<128x16xbf16, #tpu.memory_space<vmem>>, vector<128x16xbf16>
    %cst_17 = arith.constant dense<0.000000e+00> : vector<8x16xf32>
    %20 = tpu.matmul %18, %19, %cst_17 {dimension_numbers = #tpu.dot_dimension_numbers<[1], [0], [0], [1], [0, 0, 1, 1], [], []>} : vector<8x128xbf16>, vector<128x16xbf16>, vector<8x16xf32> -> vector<8x16xf32>
    %c0_18 = arith.constant 0 : index
    %c0_19 = arith.constant 0 : index
    %21 = vector.load %arg6[%c0_18, %c0_19] : memref<1x16xf32, #tpu.memory_space<vmem>>, vector<1x16xf32>
    %22 = vector.broadcast %21 : vector<1x16xf32> to vector<8x16xf32>
    %23 = arith.addf %20, %22 : vector<8x16xf32>
    %c0_20 = arith.constant 0 : index
    %c0_21 = arith.constant 0 : index
    %24 = vector.load %arg7[%c0_20, %c0_21] : memref<8x16xf32, #tpu.memory_space<vmem>>, vector<8x16xf32>
    tpu.vector_store %arg7[%c0_20, %c0_21], %23 {strides = array<i32>} : memref<8x16xf32, #tpu.memory_space<vmem>>, vector<8x16xf32>,
    return
  }
  func.func @transform_0(%arg0: i32) -> (i32, i32) {
    %c0_i32 = arith.constant 0 : i32
    %c0_i32_0 = arith.constant 0 : i32
    return %arg0, %c0_i32 : i32, i32
  }
  func.func @transform_1(%arg0: i32) -> (i32, i32) {
    %c0_i32 = arith.constant 0 : i32
    %c0_i32_0 = arith.constant 0 : i32
    return %arg0, %c0_i32 : i32, i32
  }
  func.func @transform_2(%arg0: i32) -> (i32, i32) {
    %c0_i32 = arith.constant 0 : i32
    %c0_i32_0 = arith.constant 0 : i32
    %c0_i32_1 = arith.constant 0 : i32
    return %c0_i32, %c0_i32_0 : i32, i32
  }
  func.func @transform_3(%arg0: i32) -> (i32, i32) {
    %c0_i32 = arith.constant 0 : i32
    %c0_i32_0 = arith.constant 0 : i32
    %c0_i32_1 = arith.constant 0 : i32
    return %c0_i32, %c0_i32_0 : i32, i32
  }
  func.func @transform_4(%arg0: i32) -> (i32, i32) {
    %c0_i32 = arith.constant 0 : i32
    %c0_i32_0 = arith.constant 0 : i32
    %c0_i32_1 = arith.constant 0 : i32
    return %c0_i32, %c0_i32_0 : i32, i32
  }
  func.func @transform_5(%arg0: i32) -> (i32, i32) {
    %c0_i32 = arith.constant 0 : i32
    %c0_i32_0 = arith.constant 0 : i32
    %c0_i32_1 = arith.constant 0 : i32
    return %c0_i32, %c0_i32_0 : i32, i32
  }
  func.func @transform_6(%arg0: i32) -> (i32, i32) {
    %c0_i32 = arith.constant 0 : i32
    %c0_i32_0 = arith.constant 0 : i32
    return %arg0, %c0_i32 : i32, i32
  }
}

</mosaic_0001>

<bundles_post_ra>
// kernel: tpu_custom_call.1
= control target key start
LH: loop header
LB: loop body
LE: loop exit
PB: predicated region body
PF: predicated region fallthrough
CT: control target
= control target key end

     0   :  { %11 = vsyncpa [#allocation4], 0  ;;  %s635_s0 = inlined_call_operand.vmem [shape: f32[8,32], index: 0, kind: input, shape index: {}]   ;;  %s636_s1 = inlined_call_operand.vmem [shape: f32[8,32], index: 1, kind: input, shape index: {}]   ;;  %s637_s2 = inlined_call_operand.hbm [shape: bf16[256,128], index: 2, kind: input, shape index: {}]   ;;  %s638_s3 = inlined_call_operand.vmem [shape: f32[1,128], index: 3, kind: input, shape index: {}]   ;;  %s639_s4 = inlined_call_operand.vmem [shape: bf16[128,16], index: 4, kind: input, shape index: {}]   ;;  %s640_s5 = inlined_call_operand.vmem [shape: f32[1,16], index: 5, kind: input, shape index: {}]   ;;  %s641_s6 = inlined_call_operand.hbm [shape: f32[8,16], index: 6, kind: output, shape index: {}]  }
   0x1   :  { %12 = vsyncpa [#allocation5], 0  ;;  %s525_s21 = smov [#allocation3]   ;;  %s477_s25 = scalar_lea.hbm %s637_s2, 2048 }
   0x2   :  { %s22_s22 = sshll.u32 %s525_s21, 4  ;;  %p478_p0 = scmp.ne.s32.totalorder %s637_s2, %s477_s25  ;;  %s23_s22 = int_to_ptr.vmem [resolvable:$true] %s22_s22 }
   0x3   :  { %p481_p1 = scmp.lt.u32.totalorder %s477_s25, %s637_s2 }
   0x5   :  { %p483_p2 = pnand %p481_p1, %p478_p0 }
   0x7   :  { %486 = shalt.err (!%p483_p2)
}
   0x8   :  { %s487_s30 = scalar_lea.vmem %s23_s22, 2048  ;;  %p492_p4 = scmp.lt.s32.totalorder %s23_s22, %s23_s22 }
   0x9   :  { %p488_p3 = scmp.ne.s32.totalorder %s23_s22, %s487_s30  ;;  %p493_p5 = scmp.lt.s32.totalorder %s487_s30, %s487_s30 }
   0xb   :  { %p494_p6 = por %p493_p5, %p492_p4 }
   0xd   :  { %p495_p7 = pnand %p494_p6, %p488_p3 }
   0xf   :  { %498 = shalt.err (!%p495_p7)
}
  0x10   :  { %s526_s7 = smov 64   ;;  %s527_s8 = smov 4  }
  0x11   :  { %28 = dma.hbm_to_vmem [thread:$0]  %s637_s2, 2048, %s23_s22, [#allocation4], %s526_s7, %s526_s7, %s527_s8  }
  0x12   :  { %521 = dma.done.wait [#allocation4], 2048  }
  0x13   :  { %522 = vsyncadd [#allocation4], 4294965248  ;;  %v528_v0 = vmov 0.0   ;;  %v451_v1 = vld [vmem:[#allocation3 + $0x40] sm:$0xff]   ;;  %v453_v3 = vld [vmem:[#allocation3 + $0x48] sm:$0xff]   ;;  %vm41_vm0 = vcmask 261120  }
  0x14   :  { %425 = vmatprep.subr.bf16.mxu1 %v528_v0  ;;  %v452_v2 = vld [vmem:[#allocation3] sm:$0xff]   ;;  %394 = vmatprep.subr.bf16.mxu0 %v451_v1  ;;  %v454_v4 = vld [vmem:[#allocation3 + $0x8] sm:$0xff]   ;;  %v455_v5 = vld [vmem:[#allocation3 + $0x50] sm:$0xff]   ;;  %vm529_vm1 = vmmov 0   ;;  %vm349_vm2 = vcmask 130048  }
  0x15   :  { %395 = vmatpush3.bf16.msra.mxu0 %v452_v2  ;;  %v456_v6 = vld [vmem:[#allocation3 + $0x10] sm:$0xff]   ;;  %v457_v7 = vld [vmem:[#allocation3 + $0x58] sm:$0xff]   ;;  %v459_v9 = vld [vmem:[#allocation3 + $0x60] sm:$0xff]   ;;  %441 = vmatprep.mubr.msk.bf16.mxu1 %vm529_vm1, %v528_v0 }
  0x16   :  { %396 = vmatprep.subr.bf16.mxu0 %v453_v3  ;;  %v458_v8 = vld [vmem:[#allocation3 + $0x18] sm:$0xff]   ;;  %v460_v10 = vld [vmem:[#allocation3 + $0x20] sm:$0xff]   ;;  %v461_v11 = vld [vmem:[#allocation3 + $0x68] sm:$0xff]  }
  0x17   :  { %v39_v12 = vld [vmem:[%s635_s0] sm:$0xff]  ;;  %v462_v17 = vld [vmem:[#allocation3 + $0x28] sm:$0xff]   ;;  %v463_v18 = vld [vmem:[#allocation3 + $0x70] sm:$0xff]  }
  0x18   :  { %v46_v13 = vld [vmem:[%s636_s1] sm:$0xff]  ;;  %v40_v14 = vpack.c.bf16 %v39_v12, %v39_v12  ;;  %v470_v21 = vld [vmem:[%s639_s4 + $0x8] sm:$0xff]   ;;  %v464_v22 = vld [vmem:[#allocation3 + $0x30] sm:$0xff]  }
  0x19   :  { %397 = vmatpush3.bf16.msra.mxu0 %v454_v4  ;;  %v47_v15 = vpack.c.bf16 %v46_v13, %v46_v13  ;;  %v469_v16 = vld [vmem:[%s639_s4] sm:$0xff]   ;;  %v471_v23 = vld [vmem:[%s639_s4 + $0x10] sm:$0xff]   ;;  %v472_v27 = vld [vmem:[%s639_s4 + $0x18] sm:$0xff]  }
  0x1a   :  { %398 = vmatprep.subr.bf16.mxu0 %v455_v5  ;;  %v44_v19 = vsel %vm41_vm0, %v40_v14, 0  ;;  %426 = vmatpush3.bf16.msra.mxu1 %v469_v16  ;;  %v465_v24 = vld [vmem:[#allocation3 + $0x78] sm:$0xff]   ;;  %v474_v31 = vld [vmem:[%s639_s4 + $0x28] sm:$0xff]   ;;  %v475_v32 = vld [vmem:[%s639_s4 + $0x30] sm:$0xff]  }
  0x1b   :  { %v49_v20 = vsel %vm41_vm0, %v47_v15, 0  ;;  %51 = vst [vmem:[#allocation2] sm:$0xf] %v44_v19  ;;  %427 = vmatprep.subr.bf16.mxu1 %v528_v0  ;;  %v466_v25 = vld [vmem:[#allocation3 + $0x38] sm:$0xff]   ;;  %v476_v33 = vld [vmem:[%s639_s4 + $0x38] sm:$0xff]  }
  0x1c   :  { %52 = vst [vmem:[#allocation2 + $0x4] sm:$0xf] %v49_v20  ;;  %v473_v30 = vld [vmem:[%s639_s4 + $0x20] sm:$0xff]   ;;  %s530_s4 = smov [#allocation6]  }
  0x1d   :  { %399 = vmatpush3.bf16.msra.mxu0 %v456_v6  ;;  %v366_v35 = vld [vmem:[%s638_s3] ss:$0 sm:$0xff]  ;;  %s357_s8 = sshll.u32 %s530_s4, 4  ;;  %s358_s8 = int_to_ptr.vmem [resolvable:$true] %s357_s8 }
  0x1e   :  { %400 = vmatprep.subr.bf16.mxu0 %v457_v7  ;;  %428 = vmatpush3.bf16.msra.mxu1 %v470_v21  ;;  %v385_v43 = vld [vmem:[%s640_s5] ss:$0 sm:$0xff]  ;;  %s499_s3 = scalar_lea.vmem %s358_s8, 128  ;;  %p504_p9 = scmp.lt.s32.totalorder %s358_s8, %s358_s8 }
  0x1f   :  { %429 = vmatprep.subr.bf16.mxu1 %v528_v0  ;;  %p500_p8 = scmp.ne.s32.totalorder %s358_s8, %s499_s3  ;;  %p505_p10 = scmp.lt.s32.totalorder %s499_s3, %s499_s3 }
  0x21   :  { %401 = vmatpush3.bf16.msra.mxu0 %v458_v8  ;;  %p506_p11 = por %p505_p10, %p504_p9 }
  0x22   :  { %402 = vmatprep.subr.bf16.mxu0 %v459_v9  ;;  %430 = vmatpush3.bf16.msra.mxu1 %v471_v23 }
  0x23   :  { %v53_v26 = vld [vmem:[#allocation2] sm:$0xff]  ;;  %431 = vmatprep.subr.bf16.mxu1 %v528_v0  ;;  %p507_p12 = pnand %p506_p11, %p500_p8 }
  0x24   :  { %v368_v28 = vcombine.high %v53_v26, %v53_v26  ;;  %v367_v29 = vcombine.low %v53_v26, %v53_v26 }
  0x25   :  { %403 = vmatpush3.bf16.msra.mxu0 %v460_v10 }
  0x26   :  { %404 = vmatprep.subr.bf16.mxu0 %v461_v11  ;;  %228 = vmatprep.mubr.bf16.mxu0 %v368_v28 }
  0x27   :  { %432 = vmatpush3.bf16.msra.mxu1 %v472_v27 }
  0x28   :  { %433 = vmatprep.subr.bf16.mxu1 %v528_v0 }
  0x29   :  { %405 = vmatpush3.bf16.msra.mxu0 %v462_v17 }
  0x2a   :  { %406 = vmatprep.subr.bf16.mxu0 %v463_v18 }
  0x2b   :  { %434 = vmatpush3.bf16.msra.mxu1 %v473_v30 }
  0x2c   :  { %435 = vmatprep.subr.bf16.mxu1 %v528_v0 }
  0x2d   :  { %407 = vmatpush3.bf16.msra.mxu0 %v464_v22 }
  0x2e   :  { %408 = vmatprep.subr.bf16.mxu0 %v465_v24 }
  0x2f   :  { %436 = vmatpush3.bf16.msra.mxu1 %v474_v31 }
  0x30   :  { %437 = vmatprep.subr.bf16.mxu1 %v528_v0 }
  0x31   :  { %409 = vmatpush3.bf16.msra.mxu0 %v466_v25 }
  0x33   :  { %438 = vmatpush3.bf16.msra.mxu1 %v475_v32 }
  0x34   :  { %229 = vmatmul.mubr.bf16.vlgmr.msra.gmra.mrb[0].mxu0 %v367_v29  ;;  %439 = vmatprep.subr.bf16.mxu1 %v528_v0 }
  0x37   :  { %440 = vmatpush3.bf16.msra.mxu1 %v476_v33 }
 0x107   :  { %v410_v34 = vpop.f32.mrb[0].mxu0 }
 0x108   :  { %v411_v36 = vpop.f32.mrb[1].mxu0 }
 0x109   :  { %v412_v37 = vadd.f32 %v411_v36, %v410_v34  ;;  %v413_v38 = vpop.f32.mrb[2].mxu0 }
 0x10a   :  { %v414_v39 = vpop.f32.mrb[3].mxu0 }
 0x10b   :  { %v231_v40 = vadd.f32 %v412_v37, %v366_v35 }
 0x10d   :  { %v236_v41 = vmax.f32 %v231_v40, 0.0 }
 0x10f   :  { %v237_v42 = vpack.c.bf16 %v236_v41, %v236_v41 }
 0x111   :  { %442 = vmatmul.mubr.bf16.vlgmr.msra.gmra.mrb[0].mxu1 %v237_v42 }
 0x1e4   :  { %v343_v44 = vpop.f32.mrb[0].mxu1 }
 0x1e5   :  { %v344_v45 = vadd.f32 %v385_v43, %v343_v44  ;;  %v443_v46 = vpop.f32.mrb[1].mxu1 }
 0x1e6   :  { %v346_v47 = vpop.f32.mrb[2].mxu1 }
 0x1e7   :  { %v444_v48 = vpop.f32.mrb[3].mxu1  ;;  %350 = vst.msk [vmem:[#allocation6] sm:$0xff] %vm349_vm2, %v344_v45 }
 0x1e8   :  { %510 = shalt.err (!%p507_p12)
}
 0x1e9   :  { %s511_s5 = scalar_lea.hbm %s641_s6, 128 }
 0x1ea   :  { %p512_p13 = scmp.ne.s32.totalorder %s641_s6, %s511_s5  ;;  %p515_p0 = scmp.lt.u32.totalorder %s511_s5, %s641_s6 }
 0x1ec   :  { %p517_p1 = pnand %p515_p0, %p512_p13 }
 0x1ee   :  { %520 = shalt.err (!%p517_p1)
}
 0x1ef   :  { %360 = dma.vmem_to_hbm [thread:$0]  %s358_s8, 128, %s641_s6, [#allocation5]  }
 0x1f0   :  { %523 = dma.done.wait [#allocation5], 128  }
 0x1f1   :  { %524 = vsyncadd [#allocation5], 4294967168 }
 0x1f2   :  { %364 = vsyncpa [#allocation4], 1 }
 0x1f3   :  { %365 = vsyncpa [#allocation5], 1 }

// kernel: tpu_custom_call.1
= control target key start
LH: loop header
LB: loop body
LE: loop exit
PB: predicated region body
PF: predicated region fallthrough
CT: control target
= control target key end

     0   :  { %11 = vsyncpa [#allocation4], 0  ;;  %s635_s0 = inlined_call_operand.vmem [shape: f32[8,32], index: 0, kind: input, shape index: {}]   ;;  %s636_s1 = inlined_call_operand.vmem [shape: f32[8,32], index: 1, kind: input, shape index: {}]   ;;  %s637_s2 = inlined_call_operand.hbm [shape: bf16[256,128], index: 2, kind: input, shape index: {}]   ;;  %s638_s3 = inlined_call_operand.vmem [shape: f32[1,128], index: 3, kind: input, shape index: {}]   ;;  %s639_s4 = inlined_call_operand.vmem [shape: bf16[128,16], index: 4, kind: input, shape index: {}]   ;;  %s640_s5 = inlined_call_operand.vmem [shape: f32[1,16], index: 5, kind: input, shape index: {}]   ;;  %s641_s6 = inlined_call_operand.hbm [shape: f32[8,16], index: 6, kind: output, shape index: {}]  }
   0x1   :  { %12 = vsyncpa [#allocation5], 0  ;;  %s525_s21 = smov [#allocation3]   ;;  %s477_s25 = scalar_lea.hbm %s637_s2, 2048 }
   0x2   :  { %s22_s22 = sshll.u32 %s525_s21, 4  ;;  %p478_p0 = scmp.ne.s32.totalorder %s637_s2, %s477_s25  ;;  %s23_s22 = int_to_ptr.vmem [resolvable:$true] %s22_s22 }
   0x3   :  { %p481_p1 = scmp.lt.u32.totalorder %s477_s25, %s637_s2 }
   0x5   :  { %p483_p2 = pnand %p481_p1, %p478_p0 }
   0x7   :  { %486 = shalt.err (!%p483_p2)
}
   0x8   :  { %s487_s30 = scalar_lea.vmem %s23_s22, 2048  ;;  %p492_p4 = scmp.lt.s32.totalorder %s23_s22, %s23_s22 }
   0x9   :  { %p488_p3 = scmp.ne.s32.totalorder %s23_s22, %s487_s30  ;;  %p493_p5 = scmp.lt.s32.totalorder %s487_s30, %s487_s30 }
   0xb   :  { %p494_p6 = por %p493_p5, %p492_p4 }
   0xd   :  { %p495_p7 = pnand %p494_p6, %p488_p3 }
   0xf   :  { %498 = shalt.err (!%p495_p7)
}
  0x10   :  { %s526_s7 = smov 64   ;;  %s527_s8 = smov 4  }
  0x11   :  { %28 = dma.hbm_to_vmem [thread:$0]  %s637_s2, 2048, %s23_s22, [#allocation4], %s526_s7, %s526_s7, %s527_s8  }
  0x12   :  { %521 = dma.done.wait [#allocation4], 2048  }
  0x13   :  { %522 = vsyncadd [#allocation4], 4294965248  ;;  %v528_v0 = vmov 0.0   ;;  %v451_v1 = vld [vmem:[#allocation3 + $0x40] sm:$0xff]   ;;  %v453_v3 = vld [vmem:[#allocation3 + $0x48] sm:$0xff]   ;;  %vm41_vm0 = vcmask 261120  }
  0x14   :  { %425 = vmatprep.subr.bf16.mxu1 %v528_v0  ;;  %v452_v2 = vld [vmem:[#allocation3] sm:$0xff]   ;;  %394 = vmatprep.subr.bf16.mxu0 %v451_v1  ;;  %v454_v4 = vld [vmem:[#allocation3 + $0x8] sm:$0xff]   ;;  %v455_v5 = vld [vmem:[#allocation3 + $0x50] sm:$0xff]   ;;  %vm529_vm1 = vmmov 0   ;;  %vm349_vm2 = vcmask 130048  }
  0x15   :  { %395 = vmatpush3.bf16.msra.mxu0 %v452_v2  ;;  %v456_v6 = vld [vmem:[#allocation3 + $0x10] sm:$0xff]   ;;  %v457_v7 = vld [vmem:[#allocation3 + $0x58] sm:$0xff]   ;;  %v459_v9 = vld [vmem:[#allocation3 + $0x60] sm:$0xff]   ;;  %441 = vmatprep.mubr.msk.bf16.mxu1 %vm529_vm1, %v528_v0 }
  0x16   :  { %396 = vmatprep.subr.bf16.mxu0 %v453_v3  ;;  %v458_v8 = vld [vmem:[#allocation3 + $0x18] sm:$0xff]   ;;  %v460_v10 = vld [vmem:[#allocation3 + $0x20] sm:$0xff]   ;;  %v461_v11 = vld [vmem:[#allocation3 + $0x68] sm:$0xff]  }
  0x17   :  { %v39_v12 = vld [vmem:[%s635_s0] sm:$0xff]  ;;  %v462_v17 = vld [vmem:[#allocation3 + $0x28] sm:$0xff]   ;;  %v463_v18 = vld [vmem:[#allocation3 + $0x70] sm:$0xff]  }
  0x18   :  { %v46_v13 = vld [vmem:[%s636_s1] sm:$0xff]  ;;  %v40_v14 = vpack.c.bf16 %v39_v12, %v39_v12  ;;  %v470_v21 = vld [vmem:[%s639_s4 + $0x8] sm:$0xff]   ;;  %v464_v22 = vld [vmem:[#allocation3 + $0x30] sm:$0xff]  }
  0x19   :  { %397 = vmatpush3.bf16.msra.mxu0 %v454_v4  ;;  %v47_v15 = vpack.c.bf16 %v46_v13, %v46_v13  ;;  %v469_v16 = vld [vmem:[%s639_s4] sm:$0xff]   ;;  %v471_v23 = vld [vmem:[%s639_s4 + $0x10] sm:$0xff]   ;;  %v472_v27 = vld [vmem:[%s639_s4 + $0x18] sm:$0xff]  }
  0x1a   :  { %398 = vmatprep.subr.bf16.mxu0 %v455_v5  ;;  %v44_v19 = vsel %vm41_vm0, %v40_v14, 0  ;;  %426 = vmatpush3.bf16.msra.mxu1 %v469_v16  ;;  %v465_v24 = vld [vmem:[#allocation3 + $0x78] sm:$0xff]   ;;  %v474_v31 = vld [vmem:[%s639_s4 + $0x28] sm:$0xff]   ;;  %v475_v32 = vld [vmem:[%s639_s4 + $0x30] sm:$0xff]  }
  0x1b   :  { %v49_v20 = vsel %vm41_vm0, %v47_v15, 0  ;;  %51 = vst [vmem:[#allocation2] sm:$0xf] %v44_v19  ;;  %427 = vmatprep.subr.bf16.mxu1 %v528_v0  ;;  %v466_v25 = vld [vmem:[#allocation3 + $0x38] sm:$0xff]   ;;  %v476_v33 = vld [vmem:[%s639_s4 + $0x38] sm:$0xff]  }
  0x1c   :  { %52 = vst [vmem:[#allocation2 + $0x4] sm:$0xf] %v49_v20  ;;  %v473_v30 = vld [vmem:[%s639_s4 + $0x20] sm:$0xff]   ;;  %s530_s4 = smov [#allocation6]  }
  0x1d   :  { %399 = vmatpush3.bf16.msra.mxu0 %v456_v6  ;;  %v366_v35 = vld [vmem:[%s638_s3] ss:$0 sm:$0xff]  ;;  %s357_s8 = sshll.u32 %s530_s4, 4  ;;  %s358_s8 = int_to_ptr.vmem [resolvable:$true] %s357_s8 }
  0x1e   :  { %400 = vmatprep.subr.bf16.mxu0 %v457_v7  ;;  %428 = vmatpush3.bf16.msra.mxu1 %v470_v21  ;;  %v385_v43 = vld [vmem:[%s640_s5] ss:$0 sm:$0xff]  ;;  %s499_s3 = scalar_lea.vmem %s358_s8, 128  ;;  %p504_p9 = scmp.lt.s32.totalorder %s358_s8, %s358_s8 }
  0x1f   :  { %429 = vmatprep.subr.bf16.mxu1 %v528_v0  ;;  %p500_p8 = scmp.ne.s32.totalorder %s358_s8, %s499_s3  ;;  %p505_p10 = scmp.lt.s32.totalorder %s499_s3, %s499_s3 }
  0x21   :  { %401 = vmatpush3.bf16.msra.mxu0 %v458_v8  ;;  %p506_p11 = por %p505_p10, %p504_p9 }
  0x22   :  { %402 = vmatprep.subr.bf16.mxu0 %v459_v9  ;;  %430 = vmatpush3.bf16.msra.mxu1 %v471_v23 }
  0x23   :  { %v53_v26 = vld [vmem:[#allocation2] sm:$0xff]  ;;  %431 = vmatprep.subr.bf16.mxu1 %v528_v0  ;;  %p507_p12 = pnand %p506_p11, %p500_p8 }
  0x24   :  { %v368_v28 = vcombine.high %v53_v26, %v53_v26  ;;  %v367_v29 = vcombine.low %v53_v26, %v53_v26 }
  0x25   :  { %403 = vmatpush3.bf16.msra.mxu0 %v460_v10 }
  0x26   :  { %404 = vmatprep.subr.bf16.mxu0 %v461_v11  ;;  %228 = vmatprep.mubr.bf16.mxu0 %v368_v28 }
  0x27   :  { %432 = vmatpush3.bf16.msra.mxu1 %v472_v27 }
  0x28   :  { %433 = vmatprep.subr.bf16.mxu1 %v528_v0 }
  0x29   :  { %405 = vmatpush3.bf16.msra.mxu0 %v462_v17 }
  0x2a   :  { %406 = vmatprep.subr.bf16.mxu0 %v463_v18 }
  0x2b   :  { %434 = vmatpush3.bf16.msra.mxu1 %v473_v30 }
  0x2c   :  { %435 = vmatprep.subr.bf16.mxu1 %v528_v0 }
  0x2d   :  { %407 = vmatpush3.bf16.msra.mxu0 %v464_v22 }
  0x2e   :  { %408 = vmatprep.subr.bf16.mxu0 %v465_v24 }
  0x2f   :  { %436 = vmatpush3.bf16.msra.mxu1 %v474_v31 }
  0x30   :  { %437 = vmatprep.subr.bf16.mxu1 %v528_v0 }
  0x31   :  { %409 = vmatpush3.bf16.msra.mxu0 %v466_v25 }
  0x33   :  { %438 = vmatpush3.bf16.msra.mxu1 %v475_v32 }
  0x34   :  { %229 = vmatmul.mubr.bf16.vlgmr.msra.gmra.mrb[0].mxu0 %v367_v29  ;;  %439 = vmatprep.subr.bf16.mxu1 %v528_v0 }
  0x37   :  { %440 = vmatpush3.bf16.msra.mxu1 %v476_v33 }
 0x107   :  { %v410_v34 = vpop.f32.mrb[0].mxu0 }
 0x108   :  { %v411_v36 = vpop.f32.mrb[1].mxu0 }
 0x109   :  { %v412_v37 = vadd.f32 %v411_v36, %v410_v34  ;;  %v413_v38 = vpop.f32.mrb[2].mxu0 }
 0x10a   :  { %v414_v39 = vpop.f32.mrb[3].mxu0 }
 0x10b   :  { %v231_v40 = vadd.f32 %v412_v37, %v366_v35 }
 0x10d   :  { %v236_v41 = vmax.f32 %v231_v40, 0.0 }
 0x10f   :  { %v237_v42 = vpack.c.bf16 %v236_v41, %v236_v41 }
 0x111   :  { %442 = vmatmul.mubr.bf16.vlgmr.msra.gmra.mrb[0].mxu1 %v237_v42 }
 0x1e4   :  { %v343_v44 = vpop.f32.mrb[0].mxu1 }
 0x1e5   :  { %v344_v45 = vadd.f32 %v385_v43, %v343_v44  ;;  %v443_v46 = vpop.f32.mrb[1].mxu1 }
 0x1e6   :  { %v346_v47 = vpop.f32.mrb[2].mxu1 }
 0x1e7   :  { %v444_v48 = vpop.f32.mrb[3].mxu1  ;;  %350 = vst.msk [vmem:[#allocation6] sm:$0xff] %vm349_vm2, %v344_v45 }
 0x1e8   :  { %510 = shalt.err (!%p507_p12)
}
 0x1e9   :  { %s511_s5 = scalar_lea.hbm %s641_s6, 128 }
 0x1ea   :  { %p512_p13 = scmp.ne.s32.totalorder %s641_s6, %s511_s5  ;;  %p515_p0 = scmp.lt.u32.totalorder %s511_s5, %s641_s6 }
 0x1ec   :  { %p517_p1 = pnand %p515_p0, %p512_p13 }
 0x1ee   :  { %520 = shalt.err (!%p517_p1)
}
 0x1ef   :  { %360 = dma.vmem_to_hbm [thread:$0]  %s358_s8, 128, %s641_s6, [#allocation5]  }
 0x1f0   :  { %523 = dma.done.wait [#allocation5], 128  }
 0x1f1   :  { %524 = vsyncadd [#allocation5], 4294967168 }
 0x1f2   :  { %364 = vsyncpa [#allocation4], 1 }
 0x1f3   :  { %365 = vsyncpa [#allocation5], 1 }

</bundles_post_ra>
